<compile_context>
chip_gen: v7x
topology: tpu7x:2x2x1
jax: 0.10.0
libtpu: 0.0.40
codegen_flags: <defaults>
</compile_context>

<pallas_src>
import functools

import jax
import jax.numpy as jnp
from jax.experimental import pallas as pl
from jax.experimental.pallas import tpu as pltpu

EPSILON = 1e-06


def _iou_loss_kernel(yp_ref, yt_ref, out_ref, inter_acc, ssd_acc, *,
                     rows, hw, row_tile, chunk, mask_lanes, mask_rows):
    """Accumulate per-row <yt, yp> and ||yt - yp||^2 over hw chunks; on the
    last chunk form per-row IoU, mask clipped rows, and store this row tile's
    IoU partial sum broadcast across a lane-dense (1, 128) output block."""
    i = pl.program_id(0)          # row-tile index  (parallel)
    j = pl.program_id(1)          # hw-chunk index  (arbitrary, innermost)

    @pl.when(j == 0)
    def _init():
        inter_acc[...] = jnp.zeros_like(inter_acc)
        ssd_acc[...] = jnp.zeros_like(ssd_acc)

    yp = yp_ref[...].astype(jnp.float32)          # (row_tile, chunk)
    yt = yt_ref[...].astype(jnp.float32)

    if mask_lanes:
        # Last hw chunk is clipped: zero out-of-bounds lanes so they do not
        # contribute to the reductions.
        lane = jax.lax.broadcasted_iota(jnp.int32, yp.shape, 1) + j * chunk
        valid = lane < hw
        yp = jnp.where(valid, yp, 0.0)
        yt = jnp.where(valid, yt, 0.0)

    # Ordered so at most ~3 f32 tile-sized temporaries are live at once.
    prod = yt * yp
    inter_acc[...] += jnp.sum(prod, axis=-1, keepdims=True)
    diff = yt - yp
    ssd_acc[...] += jnp.sum(diff * diff, axis=-1, keepdims=True)

    @pl.when(j == pl.num_programs(1) - 1)
    def _finalize():
        inter = inter_acc[...]                    # (row_tile, 1)
        # union = sum(yt^2) + sum(yp^2) - sum(yt*yp) = sum((yt-yp)^2) + inter
        union = inter + ssd_acc[...]
        iou = (inter + EPSILON) / (union + EPSILON)
        if mask_rows:
            # Last row tile is clipped: drop garbage rows before the sum.
            row = jax.lax.broadcasted_iota(jnp.int32, iou.shape, 0) + i * row_tile
            iou = jnp.where(row < rows, iou, 0.0)
        tile_sum = jnp.sum(iou, axis=0, keepdims=True)         # (1, 1)
        out_ref[...] = jnp.broadcast_to(tile_sum, out_ref.shape)


def _vmem_budget_bytes():
    """(target_tile_bytes, vmem_limit_bytes), generation aware."""
    cap = None
    try:
        cap = getattr(pltpu.get_tpu_info(), "vmem_capacity_bytes", None)
    except Exception:
        cap = None
    if cap is None:
        cap = 64 * 1024 * 1024                      # assume tightest (v7x per-TC)
    if cap >= 96 * 1024 * 1024:                     # v5e / v6e: 128 MiB physical
        return 4 * 1024 * 1024, 64 * 1024 * 1024
    return 3 * 1024 * 1024, 40 * 1024 * 1024        # v7x: 64 MiB per TensorCore


def iou_loss(y_pred, y_true):
    """IoU loss over heatmaps. Inputs: (N, C, H, W). Returns scalar f32."""
    assert y_pred.shape == y_true.shape
    n, c, h, w = y_pred.shape
    rows = n * c
    hw = h * w

    # No-copy views of the contiguous NCHW layout.
    yp = y_pred.reshape(rows, hw)
    yt = y_true.reshape(rows, hw)

    itemsize = jnp.dtype(y_pred.dtype).itemsize
    sublane = max(8, 32 // itemsize)        # 8 rows (f32) / 16 (bf16)
    target_tile_bytes, vmem_limit_bytes = _vmem_budget_bytes()

    # hw chunk: full hw if `sublane` rows of it fit the budget, else a
    # 128-multiple so input DMAs / lane reductions stay full width.
    max_chunk = max(128, target_tile_bytes // (sublane * itemsize))
    if hw <= max_chunk:
        chunk = hw
    else:
        chunk = max(128, (max_chunk // 128) * 128)

    # Row tile: fill the remaining budget; multiple of `sublane` (or all rows).
    row_budget = max(1, target_tile_bytes // (chunk * itemsize))
    if row_budget >= rows:
        row_tile = rows
    else:
        row_tile = max(sublane, (row_budget // sublane) * sublane)

    n_row_tiles = pl.cdiv(rows, row_tile)
    n_hw_chunks = pl.cdiv(hw, chunk)

    kernel = functools.partial(
        _iou_loss_kernel, rows=rows, hw=hw, row_tile=row_tile, chunk=chunk,
        mask_lanes=(hw % chunk != 0), mask_rows=(rows % row_tile != 0))

    cost = pl.CostEstimate(
        flops=5 * rows * hw,
        transcendentals=0,
        bytes_accessed=2 * rows * hw * itemsize + n_row_tiles * 128 * 4)

    partial_sums = pl.pallas_call(
        kernel,
        out_shape=jax.ShapeDtypeStruct((1, n_row_tiles * 128), jnp.float32),
        grid_spec=pltpu.PrefetchScalarGridSpec(
            num_scalar_prefetch=0,
            grid=(n_row_tiles, n_hw_chunks),              # reduction axis last
            in_specs=[
                pl.BlockSpec((row_tile, chunk), lambda i, j: (i, j)),
                pl.BlockSpec((row_tile, chunk), lambda i, j: (i, j)),
            ],
            out_specs=pl.BlockSpec((1, 128), lambda i, j: (0, i)),
            scratch_shapes=[
                pltpu.VMEM((row_tile, 1), jnp.float32),   # sum(yt*yp)
                pltpu.VMEM((row_tile, 1), jnp.float32),   # sum((yt-yp)^2)
            ]),
        compiler_params=pltpu.CompilerParams(
            # TODO(synk): pltpu.CORE_PARALLEL on the row axis for v7x once
            # validated on hardware; on v5e/v6e (1 TC) "parallel" is enough.
            dimension_semantics=("parallel", "arbitrary"),
            vmem_limit_bytes=vmem_limit_bytes),
        cost_estimate=cost,
    )(yp, yt)

    # One IoU partial sum per row tile, replicated across its 128-lane slab.
    tile_sums = partial_sums.reshape(n_row_tiles, 128)[:, 0]
    iou_mean = jnp.sum(tile_sums) / jnp.float32(rows)
    return (jnp.float32(1.0) - iou_mean).astype(jnp.float32)


def iou_loss_ref(y_pred, y_true):
    """Pure-JAX reference mirroring the PyTorch module."""
    def op_sum(x):
        return x.sum(-1).sum(-1)
    inter = op_sum(y_true * y_pred)
    union = op_sum(y_true ** 2) + op_sum(y_pred ** 2) - op_sum(y_true * y_pred)
    iou = (inter + EPSILON) / (union + EPSILON)
    return 1.0 - jnp.mean(iou)


if __name__ == "__main__":
    key = jax.random.PRNGKey(0)
    k1, k2 = jax.random.split(key)
    # Small NCHW heatmaps: batch=2, channels(joints)=4, spatial=16x16.
    y_pred = jax.nn.sigmoid(jax.random.normal(k1, (2, 4, 16, 16), jnp.float32))
    y_true = jax.nn.sigmoid(jax.random.normal(k2, (2, 4, 16, 16), jnp.float32))

    loss = jax.block_until_ready(iou_loss(y_pred, y_true))
    ref = jax.block_until_ready(iou_loss_ref(y_pred, y_true))

    assert jnp.allclose(loss, ref, rtol=1e-5, atol=1e-6), (loss, ref)
    print("KERNEL_OK")
</pallas_src>

<mosaic_0001>
module attributes {stable_mosaic.version = 11 : i64} {
  func.func @_iou_loss_kernel(%arg0: i32, %arg1: i32, %arg2: memref<8x256xf32, #tpu.memory_space<vmem>>, %arg3: memref<8x256xf32, #tpu.memory_space<vmem>>, %arg4: memref<1x128xf32, #tpu.memory_space<vmem>>, %arg5: memref<8x1xf32, #tpu.memory_space<vmem>>, %arg6: memref<8x1xf32, #tpu.memory_space<vmem>>) attributes {dimension_semantics = [#tpu.dimension_semantics<parallel>, #tpu.dimension_semantics<arbitrary>], iteration_bounds = array<i64: 1, 1>, scalar_prefetch = 0 : i64, scratch_operands = 2 : i64, tpu.core_type = #tpu.core_type<tc>, window_params = [{transform_indices = @transform_0, window_bounds = array<i64: 8, 256>}, {transform_indices = @transform_1, window_bounds = array<i64: 8, 256>}, {transform_indices = @transform_2, window_bounds = array<i64: 1, 128>}]} {
    %c0_i32 = arith.constant 0 : i32
    %0 = arith.cmpi eq, %arg1, %c0_i32 : i32
    %1 = arith.extui %0 : i1 to i32
    %c0_i32_0 = arith.constant 0 : i32
    %2 = arith.cmpi ne, %1, %c0_i32_0 : i32
    scf.if %2 {
      %cst_15 = arith.constant 0.000000e+00 : f32
      %21 = vector.broadcast %cst_15 : f32 to vector<8x1xf32>
      %c0_16 = arith.constant 0 : index
      %c0_17 = arith.constant 0 : index
      %22 = vector.load %arg5[%c0_16, %c0_17] : memref<8x1xf32, #tpu.memory_space<vmem>>, vector<8x1xf32>
      tpu.vector_store %arg5[%c0_16, %c0_17], %21 {strides = array<i32>} : memref<8x1xf32, #tpu.memory_space<vmem>>, vector<8x1xf32>,
      %cst_18 = arith.constant 0.000000e+00 : f32
      %23 = vector.broadcast %cst_18 : f32 to vector<8x1xf32>
      %c0_19 = arith.constant 0 : index
      %c0_20 = arith.constant 0 : index
      %24 = vector.load %arg6[%c0_19, %c0_20] : memref<8x1xf32, #tpu.memory_space<vmem>>, vector<8x1xf32>
      tpu.vector_store %arg6[%c0_19, %c0_20], %23 {strides = array<i32>} : memref<8x1xf32, #tpu.memory_space<vmem>>, vector<8x1xf32>,
    } else {
    }
    %c0 = arith.constant 0 : index
    %c0_1 = arith.constant 0 : index
    %3 = vector.load %arg2[%c0, %c0_1] : memref<8x256xf32, #tpu.memory_space<vmem>>, vector<8x256xf32>
    %c0_2 = arith.constant 0 : index
    %c0_3 = arith.constant 0 : index
    %4 = vector.load %arg3[%c0_2, %c0_3] : memref<8x256xf32, #tpu.memory_space<vmem>>, vector<8x256xf32>
    %5 = arith.mulf %4, %3 : vector<8x256xf32>
    %c0_4 = arith.constant 0 : index
    %c0_5 = arith.constant 0 : index
    %6 = vector.load %arg5[%c0_4, %c0_5] : memref<8x1xf32, #tpu.memory_space<vmem>>, vector<8x1xf32>
    %cst = arith.constant dense<0.000000e+00> : vector<8xf32>
    %7 = vector.multi_reduction <add>, %5, %cst [1] : vector<8x256xf32> to vector<8xf32>
    %8 = vector.shape_cast %7 : vector<8xf32> to vector<8x1xf32>
    %9 = arith.addf %6, %8 : vector<8x1xf32>
    %c0_6 = arith.constant 0 : index
    %c0_7 = arith.constant 0 : index
    %10 = vector.load %arg5[%c0_6, %c0_7] : memref<8x1xf32, #tpu.memory_space<vmem>>, vector<8x1xf32>
    tpu.vector_store %arg5[%c0_6, %c0_7], %9 {strides = array<i32>} : memref<8x1xf32, #tpu.memory_space<vmem>>, vector<8x1xf32>,
    %11 = arith.subf %4, %3 : vector<8x256xf32>
    %c0_8 = arith.constant 0 : index
    %c0_9 = arith.constant 0 : index
    %12 = vector.load %arg6[%c0_8, %c0_9] : memref<8x1xf32, #tpu.memory_space<vmem>>, vector<8x1xf32>
    %13 = arith.mulf %11, %11 : vector<8x256xf32>
    %cst_10 = arith.constant dense<0.000000e+00> : vector<8xf32>
    %14 = vector.multi_reduction <add>, %13, %cst_10 [1] : vector<8x256xf32> to vector<8xf32>
    %15 = vector.shape_cast %14 : vector<8xf32> to vector<8x1xf32>
    %16 = arith.addf %12, %15 : vector<8x1xf32>
    %c0_11 = arith.constant 0 : index
    %c0_12 = arith.constant 0 : index
    %17 = vector.load %arg6[%c0_11, %c0_12] : memref<8x1xf32, #tpu.memory_space<vmem>>, vector<8x1xf32>
    tpu.vector_store %arg6[%c0_11, %c0_12], %16 {strides = array<i32>} : memref<8x1xf32, #tpu.memory_space<vmem>>, vector<8x1xf32>,
    %c0_i32_13 = arith.constant 0 : i32
    %18 = arith.cmpi eq, %arg1, %c0_i32_13 : i32
    %19 = arith.extui %18 : i1 to i32
    %c0_i32_14 = arith.constant 0 : i32
    %20 = arith.cmpi ne, %19, %c0_i32_14 : i32
    scf.if %20 {
      %c0_15 = arith.constant 0 : index
      %c0_16 = arith.constant 0 : index
      %21 = vector.load %arg5[%c0_15, %c0_16] : memref<8x1xf32, #tpu.memory_space<vmem>>, vector<8x1xf32>
      %c0_17 = arith.constant 0 : index
      %c0_18 = arith.constant 0 : index
      %22 = vector.load %arg6[%c0_17, %c0_18] : memref<8x1xf32, #tpu.memory_space<vmem>>, vector<8x1xf32>
      %23 = arith.addf %21, %22 : vector<8x1xf32>
      %cst_19 = arith.constant 9.99999997E-7 : f32
      %24 = vector.broadcast %cst_19 : f32 to vector<8x1xf32>
      %25 = arith.addf %21, %24 : vector<8x1xf32>
      %cst_20 = arith.constant 9.99999997E-7 : f32
      %26 = vector.broadcast %cst_20 : f32 to vector<8x1xf32>
      %27 = arith.addf %23, %26 : vector<8x1xf32>
      %28 = arith.divf %25, %27 : vector<8x1xf32>
      %cst_21 = arith.constant dense<0.000000e+00> : vector<1xf32>
      %29 = vector.multi_reduction <add>, %28, %cst_21 [0] : vector<8x1xf32> to vector<1xf32>
      %30 = vector.shape_cast %29 : vector<1xf32> to vector<1x1xf32>
      %31 = vector.shape_cast %30 : vector<1x1xf32> to vector<1x1xf32>
      %32 = vector.broadcast %31 : vector<1x1xf32> to vector<1x128xf32>
      %c0_22 = arith.constant 0 : index
      %c0_23 = arith.constant 0 : index
      %33 = vector.load %arg4[%c0_22, %c0_23] : memref<1x128xf32, #tpu.memory_space<vmem>>, vector<1x128xf32>
      tpu.vector_store %arg4[%c0_22, %c0_23], %32 {strides = array<i32>} : memref<1x128xf32, #tpu.memory_space<vmem>>, vector<1x128xf32>,
    } else {
    }
    return
  }
  func.func @transform_0(%arg0: i32, %arg1: i32) -> (i32, i32) {
    %c0_i32 = arith.constant 0 : i32
    return %arg0, %arg1 : i32, i32
  }
  func.func @transform_1(%arg0: i32, %arg1: i32) -> (i32, i32) {
    %c0_i32 = arith.constant 0 : i32
    return %arg0, %arg1 : i32, i32
  }
  func.func @transform_2(%arg0: i32, %arg1: i32) -> (i32, i32) {
    %c0_i32 = arith.constant 0 : i32
    %c0_i32_0 = arith.constant 0 : i32
    return %c0_i32, %arg0 : i32, i32
  }
}

</mosaic_0001>

<bundles_post_ra>
// kernel: tpu_custom_call.1
= control target key start
LH: loop header
LB: loop body
LE: loop exit
PB: predicated region body
PF: predicated region fallthrough
CT: control target
= control target key end

     0   :  { %7 = vsyncpa [#allocation5], 0  ;;  %s247_s0 = inlined_call_operand.hbm [shape: f32[8,256], index: 0, kind: input, shape index: {}]   ;;  %s248_s1 = inlined_call_operand.hbm [shape: f32[8,256], index: 1, kind: input, shape index: {}]   ;;  %s249_s2 = inlined_call_operand.hbm [shape: f32[1,128], index: 2, kind: output, shape index: {}]  }
   0x1   :  { %8 = vsyncpa [#allocation8], 0 }
   0x2   :  { %9 = vsyncpa [#allocation6], 0  ;;  %s186_s9 = smov [#allocation4]   ;;  %s187_s11 = smov [#allocation7]  }
   0x3   :  { %s16_s10 = sshll.u32 %s186_s9, 4  ;;  %s26_s12 = sshll.u32 %s187_s11, 4  ;;  %s17_s10 = int_to_ptr.vmem [resolvable:$true] %s16_s10  ;;  %s27_s12 = int_to_ptr.vmem [resolvable:$true] %s26_s12 }
   0x4   :  { %s114_s15 = scalar_lea.hbm %s247_s0, 256 }
   0x5   :  { %p115_p0 = scmp.ne.s32.totalorder %s247_s0, %s114_s15  ;;  %p118_p1 = scmp.lt.u32.totalorder %s114_s15, %s247_s0 }
   0x7   :  { %p120_p2 = pnand %p118_p1, %p115_p0 }
   0x9   :  { %123 = shalt.err (!%p120_p2)
}
   0xa   :  { %s124_s20 = scalar_lea.vmem %s17_s10, 256  ;;  %p129_p4 = scmp.lt.s32.totalorder %s17_s10, %s17_s10 }
   0xb   :  { %p125_p3 = scmp.ne.s32.totalorder %s17_s10, %s124_s20  ;;  %p130_p5 = scmp.lt.s32.totalorder %s124_s20, %s124_s20 }
   0xd   :  { %p131_p6 = por %p130_p5, %p129_p4 }
   0xf   :  { %p132_p7 = pnand %p131_p6, %p125_p3 }
  0x11   :  { %135 = shalt.err (!%p132_p7)
}
  0x12   :  { %19 = dma.hbm_to_vmem [thread:$0]  %s247_s0, 256, %s17_s10, [#allocation5]  }
  0x13   :  { %s136_s25 = scalar_lea.hbm %s248_s1, 256 }
  0x14   :  { %p137_p8 = scmp.ne.s32.totalorder %s248_s1, %s136_s25  ;;  %p140_p9 = scmp.lt.u32.totalorder %s136_s25, %s248_s1 }
  0x16   :  { %p142_p10 = pnand %p140_p9, %p137_p8 }
  0x18   :  { %145 = shalt.err (!%p142_p10)
}
  0x19   :  { %s146_s30 = scalar_lea.vmem %s27_s12, 256  ;;  %p151_p12 = scmp.lt.s32.totalorder %s27_s12, %s27_s12 }
  0x1a   :  { %p147_p11 = scmp.ne.s32.totalorder %s27_s12, %s146_s30  ;;  %p152_p13 = scmp.lt.s32.totalorder %s146_s30, %s146_s30 }
  0x1c   :  { %p153_p0 = por %p152_p13, %p151_p12 }
  0x1e   :  { %p154_p1 = pnand %p153_p0, %p147_p11 }
  0x20   :  { %157 = shalt.err (!%p154_p1)
}
  0x21   :  { %29 = dma.hbm_to_vmem [thread:$0]  %s248_s1, 256, %s27_s12, [#allocation8]  }
  0x22   :  { %180 = dma.done.wait [#allocation5], 256  }
  0x23   :  { %181 = vsyncadd [#allocation5], 4294967040 }
  0x24   :  { %182 = dma.done.wait [#allocation8], 256  }
  0x25   :  { %183 = vsyncadd [#allocation8], 4294967040  ;;  %vm40_vm0 = vcmask 7168   ;;  %v188_v0 = vmov 0.0   ;;  %v43_v1 = vld [vmem:[#allocation4] sm:$0xff]  ;;  %v44_v2 = vld [vmem:[#allocation4 + $0x8] sm:$0xff] }
  0x26   :  { %41 = vst.msk [vmem:[#allocation2] sm:$0xff] %vm40_vm0, %v188_v0  ;;  %42 = vst.msk [vmem:[#allocation3] sm:$0xff] %vm40_vm0, %v188_v0  ;;  %v45_v3 = vld [vmem:[#allocation7] sm:$0xff]  ;;  %v46_v4 = vld [vmem:[#allocation7 + $0x8] sm:$0xff]  ;;  %v189_v13 = vmov 0   ;;  %s190_s1 = smov [#allocation9]  }
  0x27   :  { %v47_v5 = vmul.f32 %v45_v3, %v43_v1  ;;  %v56_v6 = vsub.f32 %v45_v3, %v43_v1  ;;  %v48_v7 = vmul.f32 %v46_v4, %v44_v2  ;;  %v57_v8 = vsub.f32 %v46_v4, %v44_v2  ;;  %110 = vset.pattern.permute.xlu1 %v189_v13  ;;  %s95_s4 = sshll.u32 %s190_s1, 4  ;;  %s96_s4 = int_to_ptr.vmem [resolvable:$true] %s95_s4 }
  0x28   :  { %111 = vset.pattern.permute.xlu0 %v189_v13  ;;  %s158_s5 = scalar_lea.vmem %s96_s4, 16  ;;  %s162_s6 = scalar_lea.vmem %s96_s4, 32 }
  0x29   :  { %v59_v9 = vmul.f32 %v56_v6, %v56_v6  ;;  %v50_v10 = vadd.f32 %v48_v7, %v47_v5  ;;  %v60_v11 = vmul.f32 %v57_v8, %v57_v8  ;;  %p159_p2 = scmp.ne.s32.totalorder %s96_s4, %s158_s5  ;;  %p163_p3 = scmp.lt.s32.totalorder %s96_s4, %s96_s4 }
  0x2a   :  { %p164_p4 = scmp.lt.s32.totalorder %s162_s6, %s158_s5 }
  0x2b   :  { %51 = vadd.xlane.f32.xlu0 %v50_v10  ;;  %v61_v12 = vadd.f32 %v60_v11, %v59_v9 }
  0x2c   :  { %p165_p5 = por %p164_p4, %p163_p3 }
  0x2d   :  { %v49_v14 = vld [vmem:[#allocation2] sm:$0xff]  ;;  %v58_v17 = vld [vmem:[#allocation3] sm:$0xff] }
  0x2e   :  { %p166_p6 = pnand %p165_p5, %p159_p2 }
  0x2f   :  { %62 = vadd.xlane.f32.xlu0 %v61_v12 }
  0xb8   :  { %v52_v15 = vpop.xlane.xlu0 %51 }
  0xb9   :  { %v53_v16 = vadd.f32 %v52_v15, %v49_v14 }
  0xbb   :  { %55 = vst.msk [vmem:[#allocation2] sm:$0xff] %vm40_vm0, %v53_v16 }
  0xbc   :  { %v63_v18 = vpop.xlane.xlu0 %62 }
  0xbd   :  { %v64_v19 = vadd.f32 %v63_v18, %v58_v17 }
  0xbf   :  { %65 = vst.msk [vmem:[#allocation3] sm:$0xff] %vm40_vm0, %v64_v19 }
  0xc2   :  { %v69_v20 = vld [vmem:[#allocation2] sm:$0xff] }
  0xc3   :  { %v72_v24 = vadd.f32 1e-06, %v69_v20 }
  0xc6   :  { %v70_v21 = vld [vmem:[#allocation3] sm:$0xff] }
  0xc7   :  { %v71_v22 = vadd.f32 %v70_v21, %v69_v20 }
  0xc9   :  { %v73_v23 = vadd.f32 1e-06, %v71_v22 }
  0xcb   :  { %112 = vrcp.f32 %v73_v23 }
  0xd5   :  { %v113_v25 = vpop.eup %112 }
  0xd6   :  { %v75_v26 = vmul.f32 %v113_v25, %v72_v24 }
  0xd8   :  { %v76_v27 = vsel %vm40_vm0, %v75_v26, 0.0 }
  0xd9   :  { %v77_v28 = vrot.slane %v76_v27, 4 }
  0xdb   :  { %v78_v29 = vadd.f32 %v77_v28, %v76_v27 }
  0xdd   :  { %v79_v30 = vrot.slane %v78_v29, 2 }
  0xdf   :  { %v80_v31 = vadd.f32 %v79_v30, %v78_v29 }
  0xe1   :  { %v81_v32 = vrot.slane %v80_v31, 1 }
  0xe3   :  { %v82_v33 = vadd.f32 %v81_v32, %v80_v31 }
  0xe5   :  { %85 = vperm.xlu1 %110, %v82_v33  }
 0x164   :  { %v86_v34 = vpop.permute.xlu1 %85 }
 0x165   :  { %88 = vst [vmem:[#allocation9] sm:$0x1] %v86_v34 }
 0x166   :  { %169 = shalt.err (!%p166_p6)
}
 0x167   :  { %s170_s9 = scalar_lea.hbm %s249_s2, 16 }
 0x168   :  { %p171_p7 = scmp.ne.s32.totalorder %s249_s2, %s170_s9  ;;  %p174_p8 = scmp.lt.u32.totalorder %s170_s9, %s249_s2 }
 0x16a   :  { %p176_p9 = pnand %p174_p8, %p171_p7 }
 0x16c   :  { %179 = shalt.err (!%p176_p9)
}
 0x16d   :  { %98 = dma.vmem_to_hbm [thread:$0]  %s96_s4, 16, %s249_s2, [#allocation6]  }
 0x16e   :  { %184 = dma.done.wait [#allocation6], 16  }
 0x16f   :  { %185 = vsyncadd [#allocation6], 4294967280 }
 0x170   :  { %102 = vsyncpa [#allocation5], 1 }
 0x171   :  { %103 = vsyncpa [#allocation8], 1 }
 0x172   :  { %104 = vsyncpa [#allocation6], 1 }

</bundles_post_ra>
